<compile_context>
chip_gen: v6e
topology: v6e:2x2x1
jax: 0.10.0
libtpu: 0.0.40
codegen_flags: <defaults>
</compile_context>

<pallas_src>
import functools
import math

import jax
import jax.numpy as jnp
from jax.experimental import pallas as pl
from jax.experimental.pallas import tpu as pltpu

# ---------------- config (small synthetic encoder) ----------------
VOCAB = 50
TYPE_VOCAB = 2
MAX_POS = 16
HIDDEN = 32
N_HEADS = 2
HEAD_DIM = HIDDEN // N_HEADS
FFN = 64
N_LAYERS = 2
NUM_LABELS = 3


# ---------------- small in-kernel helpers ----------------

def _layernorm(x, g, b):
    mu = jnp.mean(x, axis=-1, keepdims=True)
    var = jnp.mean(jnp.square(x - mu), axis=-1, keepdims=True)
    return (x - mu) * jax.lax.rsqrt(var + 1e-12) * g + b


def _gelu(x):
    # tanh-approx GELU (BERT-style); tanh goes to the EUP.
    return 0.5 * x * (1.0 + jnp.tanh(0.7978845608028654 * (x + 0.044715 * x * jnp.square(x))))


# ---------------- fused encoder kernel (one grid step == one transformer layer) ----------------

def _encoder_layer_kernel(emb_ref, bias_ref, ln0g_ref, ln0b_ref,
                          wqkv_ref, bqkv_ref, wo_ref, bo_ref,
                          ln1g_ref, ln1b_ref, w1_ref, b1_ref, w2_ref, b2_ref,
                          ln2g_ref, ln2b_ref, h_ref, *, n_heads, head_dim):
    hidden = n_heads * head_dim

    # Layer 0: initialize the resident hidden state from embeddings + embedding LN.
    @pl.when(pl.program_id(0) == 0)
    def _():
        h_ref[...] = _layernorm(emb_ref[...], ln0g_ref[...], ln0b_ref[...])

    h = h_ref[...]                       # (rows, hidden), VMEM-resident across layers
    attn_bias = bias_ref[...]            # (rows, rows) additive mask (0 / -10000)

    # Fused QKV projection: one (rows, hidden) x (hidden, 3*hidden) matmul.
    qkv = jnp.dot(h, wqkv_ref[0], preferred_element_type=jnp.float32) + bqkv_ref[0]
    wo = wo_ref[0]
    scale = 1.0 / math.sqrt(head_dim)
    qk_dims = (((1,), (1,)), ((), ()))   # q @ k.T without an explicit transpose

    # Per-head attention over all B*S rows at once; cross-sequence interactions are
    # killed by the additive bias (-10000 underflows to exactly 0 after softmax).
    attn_out = jnp.zeros_like(h)
    for hh in range(n_heads):
        c0 = hh * head_dim
        q = qkv[:, c0:c0 + head_dim]
        k = qkv[:, hidden + c0:hidden + c0 + head_dim]
        v = qkv[:, 2 * hidden + c0:2 * hidden + c0 + head_dim]
        s = jax.lax.dot_general(q, k, qk_dims, preferred_element_type=jnp.float32) * scale
        s = s + attn_bias
        m = jnp.max(s, axis=-1, keepdims=True)
        p = jnp.exp(s - m)
        p = p * pl.reciprocal(jnp.sum(p, axis=-1, keepdims=True), approx=True)
        ctx_h = jnp.dot(p, v, preferred_element_type=jnp.float32)           # (rows, head_dim)
        # merge_heads + output projection folded into a per-head partial matmul.
        attn_out = attn_out + jnp.dot(ctx_h, wo[c0:c0 + head_dim, :],
                                      preferred_element_type=jnp.float32)
    attn_out = attn_out + bo_ref[0]

    h1 = _layernorm(attn_out + h, ln1g_ref[0], ln1b_ref[0])
    ff = _gelu(jnp.dot(h1, w1_ref[0], preferred_element_type=jnp.float32) + b1_ref[0])
    ff = jnp.dot(ff, w2_ref[0], preferred_element_type=jnp.float32) + b2_ref[0]
    h_ref[...] = _layernorm(ff + h1, ln2g_ref[0], ln2b_ref[0])


def encode(params, emb, attn_bias):
    rows, hidden = emb.shape

    def rep(shape):  # layer-invariant input (same block every grid step)
        nd = len(shape)
        return pl.BlockSpec(shape, lambda l, _nd=nd: (0,) * _nd)

    def per_layer(arr):  # stacked per-layer weights: pick slab `l` on the leading axis
        nd = arr.ndim
        return pl.BlockSpec((1,) + arr.shape[1:], lambda l, _nd=nd: (l,) + (0,) * (_nd - 1))

    layer_weights = (params["Wqkv"], params["bqkv"], params["Wo"], params["bo"],
                     params["ln1_g"], params["ln1_b"], params["W1"], params["b1"],
                     params["W2"], params["b2"], params["ln2_g"], params["ln2_b"])

    kernel = functools.partial(_encoder_layer_kernel, n_heads=N_HEADS, head_dim=HEAD_DIM)
    return pl.pallas_call(
        kernel,
        out_shape=jax.ShapeDtypeStruct((rows, hidden), jnp.float32),
        grid=(N_LAYERS,),
        in_specs=[rep(emb.shape), rep(attn_bias.shape),
                  rep(params["emb_ln_g"].shape), rep(params["emb_ln_b"].shape)]
                 + [per_layer(w) for w in layer_weights],
        out_specs=pl.BlockSpec((rows, hidden), lambda l: (0, 0)),
        compiler_params=pltpu.CompilerParams(dimension_semantics=("arbitrary",)),
    )(emb, attn_bias, params["emb_ln_g"], params["emb_ln_b"], *layer_weights)


# ---------------- fused pooler + classification head (+ optional CE loss) ----------------

def _head_compute(cls, wpool, bpool, wdense, bdense, wout, bout):
    pooled = jnp.tanh(jnp.dot(cls, wpool, preferred_element_type=jnp.float32) + bpool)
    # heads.ClassificationHead: dropout (eval -> identity), dense + tanh, dropout, out_proj
    x = jnp.tanh(jnp.dot(pooled, wdense, preferred_element_type=jnp.float32) + bdense)
    return jnp.dot(x, wout, preferred_element_type=jnp.float32) + bout


def _head_kernel(cls_ref, wpool_ref, bpool_ref, wdense_ref, bdense_ref,
                 wout_ref, bout_ref, logits_ref):
    logits_ref[...] = _head_compute(cls_ref[...], wpool_ref[...], bpool_ref[...],
                                    wdense_ref[...], bdense_ref[...],
                                    wout_ref[...], bout_ref[...])


def _head_loss_kernel(cls_ref, wpool_ref, bpool_ref, wdense_ref, bdense_ref,
                      wout_ref, bout_ref, onehot_ref, logits_ref, loss_ref):
    logits = _head_compute(cls_ref[...], wpool_ref[...], bpool_ref[...],
                           wdense_ref[...], bdense_ref[...],
                           wout_ref[...], bout_ref[...])
    logits_ref[...] = logits
    # CrossEntropyLoss (mean reduction) with stable log-sum-exp.
    m = jnp.max(logits, axis=-1, keepdims=True)
    lse = jnp.log(jnp.sum(jnp.exp(logits - m), axis=-1, keepdims=True)) + m
    picked = jnp.sum(logits * onehot_ref[...], axis=-1, keepdims=True)
    loss_ref[...] = jnp.mean(lse - picked).reshape(1, 1)


def _full_spec(shape):
    nd = len(shape)
    return pl.BlockSpec(shape, lambda *_: (0,) * nd)


def classification_head(params, cls, onehot=None):
    B = cls.shape[0]
    weights = (params["Wpool"], params["bpool"], params["Wdense"], params["bdense"],
               params["Wout"], params["bout"])
    w_specs = [_full_spec(w.shape) for w in weights]
    if onehot is None:
        return pl.pallas_call(
            _head_kernel,
            out_shape=jax.ShapeDtypeStruct((B, NUM_LABELS), jnp.float32),
            in_specs=[_full_spec(cls.shape)] + w_specs,
            out_specs=_full_spec((B, NUM_LABELS)),
        )(cls, *weights)
    return pl.pallas_call(
        _head_loss_kernel,
        out_shape=(jax.ShapeDtypeStruct((B, NUM_LABELS), jnp.float32),
                   jax.ShapeDtypeStruct((1, 1), jnp.float32)),
        in_specs=[_full_spec(cls.shape)] + w_specs + [_full_spec(onehot.shape)],
        out_specs=(_full_spec((B, NUM_LABELS)), _full_spec((1, 1))),
    )(cls, *weights, onehot)


# ---------------- parameters (deterministic, synthetic; per-layer weights stacked) ----------------

def init_params(key):
    def nrm(k, shape, scale=0.02):
        return scale * jax.random.normal(k, shape, dtype=jnp.float32)

    def zeros(*s):
        return jnp.zeros(s, jnp.float32)

    def ones(*s):
        return jnp.ones(s, jnp.float32)

    keys = iter(jax.random.split(key, 32))
    params = {
        "tok_emb": nrm(next(keys), (VOCAB, HIDDEN)),
        "seg_emb": nrm(next(keys), (TYPE_VOCAB, HIDDEN)),
        "pos_emb": nrm(next(keys), (MAX_POS, HIDDEN)),
        "emb_ln_g": ones(1, HIDDEN), "emb_ln_b": zeros(1, HIDDEN),
        # per-layer encoder weights stacked on a leading layer axis (the fused kernel's grid axis)
        "Wqkv": nrm(next(keys), (N_LAYERS, HIDDEN, 3 * HIDDEN)),
        "bqkv": zeros(N_LAYERS, 1, 3 * HIDDEN),
        "Wo": nrm(next(keys), (N_LAYERS, HIDDEN, HIDDEN)),
        "bo": zeros(N_LAYERS, 1, HIDDEN),
        "ln1_g": ones(N_LAYERS, 1, HIDDEN), "ln1_b": zeros(N_LAYERS, 1, HIDDEN),
        "W1": nrm(next(keys), (N_LAYERS, HIDDEN, FFN)), "b1": zeros(N_LAYERS, 1, FFN),
        "W2": nrm(next(keys), (N_LAYERS, FFN, HIDDEN)), "b2": zeros(N_LAYERS, 1, HIDDEN),
        "ln2_g": ones(N_LAYERS, 1, HIDDEN), "ln2_b": zeros(N_LAYERS, 1, HIDDEN),
        # pooler + classification head
        "Wpool": nrm(next(keys), (HIDDEN, HIDDEN)), "bpool": zeros(1, HIDDEN),
        "Wdense": nrm(next(keys), (HIDDEN, HIDDEN)), "bdense": zeros(1, HIDDEN),
        "Wout": nrm(next(keys), (HIDDEN, NUM_LABELS)), "bout": zeros(1, NUM_LABELS),
    }
    return params


# ---------------- ClassificationModel.forward ----------------

def classification_model_forward(params, input_ids, segment_ids, input_mask,
                                 label_id=None, compute_loss=False):
    B, S = input_ids.shape
    # encoder.encode: embedding lookups are data-dependent gathers -> JAX glue.
    emb = (jnp.take(params["tok_emb"], input_ids, axis=0)
           + jnp.take(params["seg_emb"], segment_ids, axis=0)
           + params["pos_emb"][None, :S, :]).reshape(B * S, HIDDEN)

    # Additive attention bias built ONCE per forward (not per layer):
    # 0 where (same sequence AND key not padded), -10000 elsewhere.
    seq_id = jnp.arange(B * S, dtype=jnp.int32) // S
    key_ok = input_mask.reshape(-1).astype(jnp.float32) > 0.5
    allowed = (seq_id[:, None] == seq_id[None, :]) & key_ok[None, :]
    attn_bias = jnp.where(allowed, 0.0, -10000.0).astype(jnp.float32)

    h = encode(params, emb, attn_bias)                       # (B*S, HIDDEN)

    # BERT pooler input: hidden state of [CLS] (first token of each sequence).
    cls = h.reshape(B, S, HIDDEN)[:, 0, :]                   # (B, HIDDEN)

    if compute_loss:
        onehot = jax.nn.one_hot(label_id.reshape(-1), NUM_LABELS, dtype=jnp.float32)
        logits, loss = classification_head(params, cls, onehot)
        return logits, loss[0, 0]
    return classification_head(params, cls)


if __name__ == "__main__":
    key = jax.random.PRNGKey(0)
    kp, ki, ks, kl = jax.random.split(key, 4)
    params = init_params(kp)

    B, S = 2, 8
    input_ids = jax.random.randint(ki, (B, S), 0, VOCAB, dtype=jnp.int32)
    segment_ids = jax.random.randint(ks, (B, S), 0, TYPE_VOCAB, dtype=jnp.int32)
    input_mask = jnp.concatenate(
        [jnp.ones((B, 6), jnp.int32), jnp.zeros((B, 2), jnp.int32)], axis=1)
    label_id = jax.random.randint(kl, (B,), 0, NUM_LABELS, dtype=jnp.int32)

    fwd = jax.jit(classification_model_forward, static_argnames=("compute_loss",))

    # compute_loss=False path (LogitsOutput)
    logits = fwd(params, input_ids, segment_ids, input_mask)
    # compute_loss=True path (LogitsAndLossOutput)
    logits2, loss = fwd(params, input_ids, segment_ids, input_mask,
                        label_id=label_id, compute_loss=True)

    jax.block_until_ready((logits, logits2, loss))
    print("KERNEL_OK")
</pallas_src>

<mosaic_0001>
module attributes {stable_mosaic.version = 11 : i64} {
  func.func @_encoder_layer_kernel(%arg0: i32, %arg1: memref<16x32xf32, #tpu.memory_space<vmem>>, %arg2: memref<16x16xf32, #tpu.memory_space<vmem>>, %arg3: memref<1x32xf32, #tpu.memory_space<vmem>>, %arg4: memref<1x32xf32, #tpu.memory_space<vmem>>, %arg5: memref<1x32x96xf32, #tpu.memory_space<vmem>>, %arg6: memref<1x1x96xf32, #tpu.memory_space<vmem>>, %arg7: memref<1x32x32xf32, #tpu.memory_space<vmem>>, %arg8: memref<1x1x32xf32, #tpu.memory_space<vmem>>, %arg9: memref<1x1x32xf32, #tpu.memory_space<vmem>>, %arg10: memref<1x1x32xf32, #tpu.memory_space<vmem>>, %arg11: memref<1x32x64xf32, #tpu.memory_space<vmem>>, %arg12: memref<1x1x64xf32, #tpu.memory_space<vmem>>, %arg13: memref<1x64x32xf32, #tpu.memory_space<vmem>>, %arg14: memref<1x1x32xf32, #tpu.memory_space<vmem>>, %arg15: memref<1x1x32xf32, #tpu.memory_space<vmem>>, %arg16: memref<1x1x32xf32, #tpu.memory_space<vmem>>, %arg17: memref<16x32xf32, #tpu.memory_space<vmem>>) attributes {dimension_semantics = [#tpu.dimension_semantics<arbitrary>], iteration_bounds = array<i64: 2>, scalar_prefetch = 0 : i64, scratch_operands = 0 : i64, tpu.core_type = #tpu.core_type<tc>, window_params = [{pipeline_mode = #tpu.pipeline_mode<synchronous>, transform_indices = @transform_0, window_bounds = array<i64: 16, 32>}, {pipeline_mode = #tpu.pipeline_mode<synchronous>, transform_indices = @transform_1, window_bounds = array<i64: 16, 16>}, {pipeline_mode = #tpu.pipeline_mode<synchronous>, transform_indices = @transform_2, window_bounds = array<i64: 1, 32>}, {pipeline_mode = #tpu.pipeline_mode<synchronous>, transform_indices = @transform_3, window_bounds = array<i64: 1, 32>}, {transform_indices = @transform_4, window_bounds = array<i64: 1, 32, 96>}, {transform_indices = @transform_5, window_bounds = array<i64: 1, 1, 96>}, {transform_indices = @transform_6, window_bounds = array<i64: 1, 32, 32>}, {transform_indices = @transform_7, window_bounds = array<i64: 1, 1, 32>}, {transform_indices = @transform_8, window_bounds = array<i64: 1, 1, 32>}, {transform_indices = @transform_9, window_bounds = array<i64: 1, 1, 32>}, {transform_indices = @transform_10, window_bounds = array<i64: 1, 32, 64>}, {transform_indices = @transform_11, window_bounds = array<i64: 1, 1, 64>}, {transform_indices = @transform_12, window_bounds = array<i64: 1, 64, 32>}, {transform_indices = @transform_13, window_bounds = array<i64: 1, 1, 32>}, {transform_indices = @transform_14, window_bounds = array<i64: 1, 1, 32>}, {transform_indices = @transform_15, window_bounds = array<i64: 1, 1, 32>}, {pipeline_mode = #tpu.pipeline_mode<synchronous>, transform_indices = @transform_16, window_bounds = array<i64: 16, 32>}]} {
    %c0_i32 = arith.constant 0 : i32
    %0 = arith.cmpi eq, %arg0, %c0_i32 : i32
    %1 = arith.extui %0 : i1 to i32
    %c0_i32_0 = arith.constant 0 : i32
    %2 = arith.cmpi ne, %1, %c0_i32_0 : i32
    scf.if %2 {
      %c0_71 = arith.constant 0 : index
      %c0_72 = arith.constant 0 : index
      %143 = vector.load %arg1[%c0_71, %c0_72] : memref<16x32xf32, #tpu.memory_space<vmem>>, vector<16x32xf32>
      %c0_73 = arith.constant 0 : index
      %c0_74 = arith.constant 0 : index
      %144 = vector.load %arg3[%c0_73, %c0_74] : memref<1x32xf32, #tpu.memory_space<vmem>>, vector<1x32xf32>
      %c0_75 = arith.constant 0 : index
      %c0_76 = arith.constant 0 : index
      %145 = vector.load %arg4[%c0_75, %c0_76] : memref<1x32xf32, #tpu.memory_space<vmem>>, vector<1x32xf32>
      %cst_77 = arith.constant dense<0.000000e+00> : vector<16xf32>
      %146 = vector.multi_reduction <add>, %143, %cst_77 [1] : vector<16x32xf32> to vector<16xf32>
      %147 = vector.shape_cast %146 : vector<16xf32> to vector<16x1xf32>
      %cst_78 = arith.constant 3.200000e+01 : f32
      %148 = vector.broadcast %cst_78 : f32 to vector<16x1xf32>
      %149 = arith.divf %147, %148 : vector<16x1xf32>
      %150 = vector.broadcast %149 : vector<16x1xf32> to vector<16x32xf32>
      %151 = arith.subf %143, %150 : vector<16x32xf32>
      %152 = arith.mulf %151, %151 : vector<16x32xf32>
      %cst_79 = arith.constant dense<0.000000e+00> : vector<16xf32>
      %153 = vector.multi_reduction <add>, %152, %cst_79 [1] : vector<16x32xf32> to vector<16xf32>
      %154 = vector.shape_cast %153 : vector<16xf32> to vector<16x1xf32>
      %cst_80 = arith.constant 3.200000e+01 : f32
      %155 = vector.broadcast %cst_80 : f32 to vector<16x1xf32>
      %156 = arith.divf %154, %155 : vector<16x1xf32>
      %157 = vector.broadcast %149 : vector<16x1xf32> to vector<16x32xf32>
      %158 = arith.subf %143, %157 : vector<16x32xf32>
      %cst_81 = arith.constant 9.99999996E-13 : f32
      %159 = vector.broadcast %cst_81 : f32 to vector<16x1xf32>
      %160 = arith.addf %156, %159 : vector<16x1xf32>
      %161 = math.rsqrt %160 : vector<16x1xf32>
      %162 = vector.broadcast %161 : vector<16x1xf32> to vector<16x32xf32>
      %163 = arith.mulf %158, %162 : vector<16x32xf32>
      %164 = vector.broadcast %144 : vector<1x32xf32> to vector<16x32xf32>
      %165 = arith.mulf %163, %164 : vector<16x32xf32>
      %166 = vector.broadcast %145 : vector<1x32xf32> to vector<16x32xf32>
      %167 = arith.addf %165, %166 : vector<16x32xf32>
      %c0_82 = arith.constant 0 : index
      %c0_83 = arith.constant 0 : index
      %168 = vector.load %arg17[%c0_82, %c0_83] : memref<16x32xf32, #tpu.memory_space<vmem>>, vector<16x32xf32>
      tpu.vector_store %arg17[%c0_82, %c0_83], %167 {strides = array<i32>} : memref<16x32xf32, #tpu.memory_space<vmem>>, vector<16x32xf32>,
    } else {
    }
    %c0 = arith.constant 0 : index
    %c0_1 = arith.constant 0 : index
    %3 = vector.load %arg17[%c0, %c0_1] : memref<16x32xf32, #tpu.memory_space<vmem>>, vector<16x32xf32>
    %c0_2 = arith.constant 0 : index
    %c0_3 = arith.constant 0 : index
    %4 = vector.load %arg2[%c0_2, %c0_3] : memref<16x16xf32, #tpu.memory_space<vmem>>, vector<16x16xf32>
    %c0_4 = arith.constant 0 : index
    %c0_5 = arith.constant 0 : index
    %c0_6 = arith.constant 0 : index
    %5 = vector.load %arg5[%c0_4, %c0_5, %c0_6] : memref<1x32x96xf32, #tpu.memory_space<vmem>>, vector<1x32x96xf32>
    %6 = vector.shape_cast %5 : vector<1x32x96xf32> to vector<32x96xf32>
    %cst = arith.constant dense<0.000000e+00> : vector<16x96xf32>
    %7 = tpu.matmul %3, %6, %cst {dimension_numbers = #tpu.dot_dimension_numbers<[1], [0], [0], [1], [0, 0, 1, 1], [], []>} : vector<16x32xf32>, vector<32x96xf32>, vector<16x96xf32> -> vector<16x96xf32>
    %c0_7 = arith.constant 0 : index
    %c0_8 = arith.constant 0 : index
    %c0_9 = arith.constant 0 : index
    %8 = vector.load %arg6[%c0_7, %c0_8, %c0_9] : memref<1x1x96xf32, #tpu.memory_space<vmem>>, vector<1x1x96xf32>
    %9 = vector.shape_cast %8 : vector<1x1x96xf32> to vector<1x96xf32>
    %10 = vector.broadcast %9 : vector<1x96xf32> to vector<16x96xf32>
    %11 = arith.addf %7, %10 : vector<16x96xf32>
    %c0_10 = arith.constant 0 : index
    %c0_11 = arith.constant 0 : index
    %c0_12 = arith.constant 0 : index
    %12 = vector.load %arg7[%c0_10, %c0_11, %c0_12] : memref<1x32x32xf32, #tpu.memory_space<vmem>>, vector<1x32x32xf32>
    %13 = vector.shape_cast %12 : vector<1x32x32xf32> to vector<32x32xf32>
    %cst_13 = arith.constant 0.000000e+00 : f32
    %14 = vector.broadcast %cst_13 : f32 to vector<16x32xf32>
    %15 = vector.extract_strided_slice %11 {offsets = [0, 0], sizes = [16, 16], strides = [1, 1]} : vector<16x96xf32> to vector<16x16xf32>
    %16 = vector.extract_strided_slice %11 {offsets = [0, 32], sizes = [16, 16], strides = [1, 1]} : vector<16x96xf32> to vector<16x16xf32>
    %17 = vector.extract_strided_slice %11 {offsets = [0, 64], sizes = [16, 16], strides = [1, 1]} : vector<16x96xf32> to vector<16x16xf32>
    %cst_14 = arith.constant dense<0.000000e+00> : vector<16x16xf32>
    %18 = tpu.matmul %15, %16, %cst_14 {dimension_numbers = #tpu.dot_dimension_numbers<[1], [1], [0], [0], [0, 0, 1, 0], [], []>} : vector<16x16xf32>, vector<16x16xf32>, vector<16x16xf32> -> vector<16x16xf32>
    %cst_15 = arith.constant 2.500000e-01 : f32
    %19 = vector.broadcast %cst_15 : f32 to vector<16x16xf32>
    %20 = arith.mulf %18, %19 : vector<16x16xf32>
    %21 = arith.addf %20, %4 : vector<16x16xf32>
    %cst_16 = arith.constant dense<0xFF800000> : vector<16xf32>
    %22 = vector.multi_reduction <maximumf>, %21, %cst_16 [1] : vector<16x16xf32> to vector<16xf32>
    %23 = vector.shape_cast %22 : vector<16xf32> to vector<16x1xf32>
    %24 = vector.broadcast %23 : vector<16x1xf32> to vector<16x16xf32>
    %25 = arith.subf %21, %24 : vector<16x16xf32>
    %26 = math.exp %25 : vector<16x16xf32>
    %cst_17 = arith.constant dense<0.000000e+00> : vector<16xf32>
    %27 = vector.multi_reduction <add>, %26, %cst_17 [1] : vector<16x16xf32> to vector<16xf32>
    %28 = vector.shape_cast %27 : vector<16xf32> to vector<16x1xf32>
    %29 = tpu.reciprocal %28 {approx = true} : vector<16x1xf32> -> vector<16x1xf32>
    %30 = vector.broadcast %29 : vector<16x1xf32> to vector<16x16xf32>
    %31 = arith.mulf %26, %30 : vector<16x16xf32>
    %cst_18 = arith.constant dense<0.000000e+00> : vector<16x16xf32>
    %32 = tpu.matmul %31, %17, %cst_18 {dimension_numbers = #tpu.dot_dimension_numbers<[1], [0], [0], [1], [0, 0, 1, 1], [], []>} : vector<16x16xf32>, vector<16x16xf32>, vector<16x16xf32> -> vector<16x16xf32>
    %33 = vector.extract_strided_slice %13 {offsets = [0, 0], sizes = [16, 32], strides = [1, 1]} : vector<32x32xf32> to vector<16x32xf32>
    %cst_19 = arith.constant dense<0.000000e+00> : vector<16x32xf32>
    %34 = tpu.matmul %32, %33, %cst_19 {dimension_numbers = #tpu.dot_dimension_numbers<[1], [0], [0], [1], [0, 0, 1, 1], [], []>} : vector<16x16xf32>, vector<16x32xf32>, vector<16x32xf32> -> vector<16x32xf32>
    %35 = arith.addf %14, %34 : vector<16x32xf32>
    %36 = vector.extract_strided_slice %11 {offsets = [0, 16], sizes = [16, 16], strides = [1, 1]} : vector<16x96xf32> to vector<16x16xf32>
    %37 = vector.extract_strided_slice %11 {offsets = [0, 48], sizes = [16, 16], strides = [1, 1]} : vector<16x96xf32> to vector<16x16xf32>
    %38 = vector.extract_strided_slice %11 {offsets = [0, 80], sizes = [16, 16], strides = [1, 1]} : vector<16x96xf32> to vector<16x16xf32>
    %cst_20 = arith.constant dense<0.000000e+00> : vector<16x16xf32>
    %39 = tpu.matmul %36, %37, %cst_20 {dimension_numbers = #tpu.dot_dimension_numbers<[1], [1], [0], [0], [0, 0, 1, 0], [], []>} : vector<16x16xf32>, vector<16x16xf32>, vector<16x16xf32> -> vector<16x16xf32>
    %cst_21 = arith.constant 2.500000e-01 : f32
    %40 = vector.broadcast %cst_21 : f32 to vector<16x16xf32>
    %41 = arith.mulf %39, %40 : vector<16x16xf32>
    %42 = arith.addf %41, %4 : vector<16x16xf32>
    %cst_22 = arith.constant dense<0xFF800000> : vector<16xf32>
    %43 = vector.multi_reduction <maximumf>, %42, %cst_22 [1] : vector<16x16xf32> to vector<16xf32>
    %44 = vector.shape_cast %43 : vector<16xf32> to vector<16x1xf32>
    %45 = vector.broadcast %44 : vector<16x1xf32> to vector<16x16xf32>
    %46 = arith.subf %42, %45 : vector<16x16xf32>
    %47 = math.exp %46 : vector<16x16xf32>
    %cst_23 = arith.constant dense<0.000000e+00> : vector<16xf32>
    %48 = vector.multi_reduction <add>, %47, %cst_23 [1] : vector<16x16xf32> to vector<16xf32>
    %49 = vector.shape_cast %48 : vector<16xf32> to vector<16x1xf32>
    %50 = tpu.reciprocal %49 {approx = true} : vector<16x1xf32> -> vector<16x1xf32>
    %51 = vector.broadcast %50 : vector<16x1xf32> to vector<16x16xf32>
    %52 = arith.mulf %47, %51 : vector<16x16xf32>
    %cst_24 = arith.constant dense<0.000000e+00> : vector<16x16xf32>
    %53 = tpu.matmul %52, %38, %cst_24 {dimension_numbers = #tpu.dot_dimension_numbers<[1], [0], [0], [1], [0, 0, 1, 1], [], []>} : vector<16x16xf32>, vector<16x16xf32>, vector<16x16xf32> -> vector<16x16xf32>
    %54 = vector.extract_strided_slice %13 {offsets = [16, 0], sizes = [16, 32], strides = [1, 1]} : vector<32x32xf32> to vector<16x32xf32>
    %cst_25 = arith.constant dense<0.000000e+00> : vector<16x32xf32>
    %55 = tpu.matmul %53, %54, %cst_25 {dimension_numbers = #tpu.dot_dimension_numbers<[1], [0], [0], [1], [0, 0, 1, 1], [], []>} : vector<16x16xf32>, vector<16x32xf32>, vector<16x32xf32> -> vector<16x32xf32>
    %56 = arith.addf %35, %55 : vector<16x32xf32>
    %c0_26 = arith.constant 0 : index
    %c0_27 = arith.constant 0 : index
    %c0_28 = arith.constant 0 : index
    %57 = vector.load %arg8[%c0_26, %c0_27, %c0_28] : memref<1x1x32xf32, #tpu.memory_space<vmem>>, vector<1x1x32xf32>
    %58 = vector.shape_cast %57 : vector<1x1x32xf32> to vector<1x32xf32>
    %59 = vector.broadcast %58 : vector<1x32xf32> to vector<16x32xf32>
    %60 = arith.addf %56, %59 : vector<16x32xf32>
    %61 = arith.addf %60, %3 : vector<16x32xf32>
    %c0_29 = arith.constant 0 : index
    %c0_30 = arith.constant 0 : index
    %c0_31 = arith.constant 0 : index
    %62 = vector.load %arg9[%c0_29, %c0_30, %c0_31] : memref<1x1x32xf32, #tpu.memory_space<vmem>>, vector<1x1x32xf32>
    %63 = vector.shape_cast %62 : vector<1x1x32xf32> to vector<1x32xf32>
    %c0_32 = arith.constant 0 : index
    %c0_33 = arith.constant 0 : index
    %c0_34 = arith.constant 0 : index
    %64 = vector.load %arg10[%c0_32, %c0_33, %c0_34] : memref<1x1x32xf32, #tpu.memory_space<vmem>>, vector<1x1x32xf32>
    %65 = vector.shape_cast %64 : vector<1x1x32xf32> to vector<1x32xf32>
    %cst_35 = arith.constant dense<0.000000e+00> : vector<16xf32>
    %66 = vector.multi_reduction <add>, %61, %cst_35 [1] : vector<16x32xf32> to vector<16xf32>
    %67 = vector.shape_cast %66 : vector<16xf32> to vector<16x1xf32>
    %cst_36 = arith.constant 3.200000e+01 : f32
    %68 = vector.broadcast %cst_36 : f32 to vector<16x1xf32>
    %69 = arith.divf %67, %68 : vector<16x1xf32>
    %70 = vector.broadcast %69 : vector<16x1xf32> to vector<16x32xf32>
    %71 = arith.subf %61, %70 : vector<16x32xf32>
    %72 = arith.mulf %71, %71 : vector<16x32xf32>
    %cst_37 = arith.constant dense<0.000000e+00> : vector<16xf32>
    %73 = vector.multi_reduction <add>, %72, %cst_37 [1] : vector<16x32xf32> to vector<16xf32>
    %74 = vector.shape_cast %73 : vector<16xf32> to vector<16x1xf32>
    %cst_38 = arith.constant 3.200000e+01 : f32
    %75 = vector.broadcast %cst_38 : f32 to vector<16x1xf32>
    %76 = arith.divf %74, %75 : vector<16x1xf32>
    %77 = vector.broadcast %69 : vector<16x1xf32> to vector<16x32xf32>
    %78 = arith.subf %61, %77 : vector<16x32xf32>
    %cst_39 = arith.constant 9.99999996E-13 : f32
    %79 = vector.broadcast %cst_39 : f32 to vector<16x1xf32>
    %80 = arith.addf %76, %79 : vector<16x1xf32>
    %81 = math.rsqrt %80 : vector<16x1xf32>
    %82 = vector.broadcast %81 : vector<16x1xf32> to vector<16x32xf32>
    %83 = arith.mulf %78, %82 : vector<16x32xf32>
    %84 = vector.broadcast %63 : vector<1x32xf32> to vector<16x32xf32>
    %85 = arith.mulf %83, %84 : vector<16x32xf32>
    %86 = vector.broadcast %65 : vector<1x32xf32> to vector<16x32xf32>
    %87 = arith.addf %85, %86 : vector<16x32xf32>
    %c0_40 = arith.constant 0 : index
    %c0_41 = arith.constant 0 : index
    %c0_42 = arith.constant 0 : index
    %88 = vector.load %arg11[%c0_40, %c0_41, %c0_42] : memref<1x32x64xf32, #tpu.memory_space<vmem>>, vector<1x32x64xf32>
    %89 = vector.shape_cast %88 : vector<1x32x64xf32> to vector<32x64xf32>
    %cst_43 = arith.constant dense<0.000000e+00> : vector<16x64xf32>
    %90 = tpu.matmul %87, %89, %cst_43 {dimension_numbers = #tpu.dot_dimension_numbers<[1], [0], [0], [1], [0, 0, 1, 1], [], []>} : vector<16x32xf32>, vector<32x64xf32>, vector<16x64xf32> -> vector<16x64xf32>
    %c0_44 = arith.constant 0 : index
    %c0_45 = arith.constant 0 : index
    %c0_46 = arith.constant 0 : index
    %91 = vector.load %arg12[%c0_44, %c0_45, %c0_46] : memref<1x1x64xf32, #tpu.memory_space<vmem>>, vector<1x1x64xf32>
    %92 = vector.shape_cast %91 : vector<1x1x64xf32> to vector<1x64xf32>
    %93 = vector.broadcast %92 : vector<1x64xf32> to vector<16x64xf32>
    %94 = arith.addf %90, %93 : vector<16x64xf32>
    %cst_47 = arith.constant 5.000000e-01 : f32
    %95 = vector.broadcast %cst_47 : f32 to vector<16x64xf32>
    %96 = arith.mulf %95, %94 : vector<16x64xf32>
    %cst_48 = arith.constant 4.471500e-02 : f32
    %97 = vector.broadcast %cst_48 : f32 to vector<16x64xf32>
    %98 = arith.mulf %97, %94 : vector<16x64xf32>
    %99 = arith.mulf %94, %94 : vector<16x64xf32>
    %100 = arith.mulf %98, %99 : vector<16x64xf32>
    %101 = arith.addf %94, %100 : vector<16x64xf32>
    %cst_49 = arith.constant 0.797884583 : f32
    %102 = vector.broadcast %cst_49 : f32 to vector<16x64xf32>
    %103 = arith.mulf %102, %101 : vector<16x64xf32>
    %104 = math.tanh %103 : vector<16x64xf32>
    %cst_50 = arith.constant 1.000000e+00 : f32
    %105 = vector.broadcast %cst_50 : f32 to vector<16x64xf32>
    %106 = arith.addf %105, %104 : vector<16x64xf32>
    %107 = arith.mulf %96, %106 : vector<16x64xf32>
    %c0_51 = arith.constant 0 : index
    %c0_52 = arith.constant 0 : index
    %c0_53 = arith.constant 0 : index
    %108 = vector.load %arg13[%c0_51, %c0_52, %c0_53] : memref<1x64x32xf32, #tpu.memory_space<vmem>>, vector<1x64x32xf32>
    %109 = vector.shape_cast %108 : vector<1x64x32xf32> to vector<64x32xf32>
    %cst_54 = arith.constant dense<0.000000e+00> : vector<16x32xf32>
    %110 = tpu.matmul %107, %109, %cst_54 {dimension_numbers = #tpu.dot_dimension_numbers<[1], [0], [0], [1], [0, 0, 1, 1], [], []>} : vector<16x64xf32>, vector<64x32xf32>, vector<16x32xf32> -> vector<16x32xf32>
    %c0_55 = arith.constant 0 : index
    %c0_56 = arith.constant 0 : index
    %c0_57 = arith.constant 0 : index
    %111 = vector.load %arg14[%c0_55, %c0_56, %c0_57] : memref<1x1x32xf32, #tpu.memory_space<vmem>>, vector<1x1x32xf32>
    %112 = vector.shape_cast %111 : vector<1x1x32xf32> to vector<1x32xf32>
    %113 = vector.broadcast %112 : vector<1x32xf32> to vector<16x32xf32>
    %114 = arith.addf %110, %113 : vector<16x32xf32>
    %115 = arith.addf %114, %87 : vector<16x32xf32>
    %c0_58 = arith.constant 0 : index
    %c0_59 = arith.constant 0 : index
    %c0_60 = arith.constant 0 : index
    %116 = vector.load %arg15[%c0_58, %c0_59, %c0_60] : memref<1x1x32xf32, #tpu.memory_space<vmem>>, vector<1x1x32xf32>
    %117 = vector.shape_cast %116 : vector<1x1x32xf32> to vector<1x32xf32>
    %c0_61 = arith.constant 0 : index
    %c0_62 = arith.constant 0 : index
    %c0_63 = arith.constant 0 : index
    %118 = vector.load %arg16[%c0_61, %c0_62, %c0_63] : memref<1x1x32xf32, #tpu.memory_space<vmem>>, vector<1x1x32xf32>
    %119 = vector.shape_cast %118 : vector<1x1x32xf32> to vector<1x32xf32>
    %cst_64 = arith.constant dense<0.000000e+00> : vector<16xf32>
    %120 = vector.multi_reduction <add>, %115, %cst_64 [1] : vector<16x32xf32> to vector<16xf32>
    %121 = vector.shape_cast %120 : vector<16xf32> to vector<16x1xf32>
    %cst_65 = arith.constant 3.200000e+01 : f32
    %122 = vector.broadcast %cst_65 : f32 to vector<16x1xf32>
    %123 = arith.divf %121, %122 : vector<16x1xf32>
    %124 = vector.broadcast %123 : vector<16x1xf32> to vector<16x32xf32>
    %125 = arith.subf %115, %124 : vector<16x32xf32>
    %126 = arith.mulf %125, %125 : vector<16x32xf32>
    %cst_66 = arith.constant dense<0.000000e+00> : vector<16xf32>
    %127 = vector.multi_reduction <add>, %126, %cst_66 [1] : vector<16x32xf32> to vector<16xf32>
    %128 = vector.shape_cast %127 : vector<16xf32> to vector<16x1xf32>
    %cst_67 = arith.constant 3.200000e+01 : f32
    %129 = vector.broadcast %cst_67 : f32 to vector<16x1xf32>
    %130 = arith.divf %128, %129 : vector<16x1xf32>
    %131 = vector.broadcast %123 : vector<16x1xf32> to vector<16x32xf32>
    %132 = arith.subf %115, %131 : vector<16x32xf32>
    %cst_68 = arith.constant 9.99999996E-13 : f32
    %133 = vector.broadcast %cst_68 : f32 to vector<16x1xf32>
    %134 = arith.addf %130, %133 : vector<16x1xf32>
    %135 = math.rsqrt %134 : vector<16x1xf32>
    %136 = vector.broadcast %135 : vector<16x1xf32> to vector<16x32xf32>
    %137 = arith.mulf %132, %136 : vector<16x32xf32>
    %138 = vector.broadcast %117 : vector<1x32xf32> to vector<16x32xf32>
    %139 = arith.mulf %137, %138 : vector<16x32xf32>
    %140 = vector.broadcast %119 : vector<1x32xf32> to vector<16x32xf32>
    %141 = arith.addf %139, %140 : vector<16x32xf32>
    %c0_69 = arith.constant 0 : index
    %c0_70 = arith.constant 0 : index
    %142 = vector.load %arg17[%c0_69, %c0_70] : memref<16x32xf32, #tpu.memory_space<vmem>>, vector<16x32xf32>
    tpu.vector_store %arg17[%c0_69, %c0_70], %141 {strides = array<i32>} : memref<16x32xf32, #tpu.memory_space<vmem>>, vector<16x32xf32>,
    return
  }
  func.func @transform_0(%arg0: i32) -> (i32, i32) {
    %c0_i32 = arith.constant 0 : i32
    %c0_i32_0 = arith.constant 0 : i32
    %c0_i32_1 = arith.constant 0 : i32
    return %c0_i32, %c0_i32_0 : i32, i32
  }
  func.func @transform_1(%arg0: i32) -> (i32, i32) {
    %c0_i32 = arith.constant 0 : i32
    %c0_i32_0 = arith.constant 0 : i32
    %c0_i32_1 = arith.constant 0 : i32
    return %c0_i32, %c0_i32_0 : i32, i32
  }
  func.func @transform_2(%arg0: i32) -> (i32, i32) {
    %c0_i32 = arith.constant 0 : i32
    %c0_i32_0 = arith.constant 0 : i32
    %c0_i32_1 = arith.constant 0 : i32
    return %c0_i32, %c0_i32_0 : i32, i32
  }
  func.func @transform_3(%arg0: i32) -> (i32, i32) {
    %c0_i32 = arith.constant 0 : i32
    %c0_i32_0 = arith.constant 0 : i32
    %c0_i32_1 = arith.constant 0 : i32
    return %c0_i32, %c0_i32_0 : i32, i32
  }
  func.func @transform_4(%arg0: i32) -> (i32, i32, i32) {
    %c0_i32 = arith.constant 0 : i32
    %c0_i32_0 = arith.constant 0 : i32
    %c0_i32_1 = arith.constant 0 : i32
    return %arg0, %c0_i32, %c0_i32_0 : i32, i32, i32
  }
  func.func @transform_5(%arg0: i32) -> (i32, i32, i32) {
    %c0_i32 = arith.constant 0 : i32
    %c0_i32_0 = arith.constant 0 : i32
    %c0_i32_1 = arith.constant 0 : i32
    return %arg0, %c0_i32, %c0_i32_0 : i32, i32, i32
  }
  func.func @transform_6(%arg0: i32) -> (i32, i32, i32) {
    %c0_i32 = arith.constant 0 : i32
    %c0_i32_0 = arith.constant 0 : i32
    %c0_i32_1 = arith.constant 0 : i32
    return %arg0, %c0_i32, %c0_i32_0 : i32, i32, i32
  }
  func.func @transform_7(%arg0: i32) -> (i32, i32, i32) {
    %c0_i32 = arith.constant 0 : i32
    %c0_i32_0 = arith.constant 0 : i32
    %c0_i32_1 = arith.constant 0 : i32
    return %arg0, %c0_i32, %c0_i32_0 : i32, i32, i32
  }
  func.func @transform_8(%arg0: i32) -> (i32, i32, i32) {
    %c0_i32 = arith.constant 0 : i32
    %c0_i32_0 = arith.constant 0 : i32
    %c0_i32_1 = arith.constant 0 : i32
    return %arg0, %c0_i32, %c0_i32_0 : i32, i32, i32
  }
  func.func @transform_9(%arg0: i32) -> (i32, i32, i32) {
    %c0_i32 = arith.constant 0 : i32
    %c0_i32_0 = arith.constant 0 : i32
    %c0_i32_1 = arith.constant 0 : i32
    return %arg0, %c0_i32, %c0_i32_0 : i32, i32, i32
  }
  func.func @transform_10(%arg0: i32) -> (i32, i32, i32) {
    %c0_i32 = arith.constant 0 : i32
    %c0_i32_0 = arith.constant 0 : i32
    %c0_i32_1 = arith.constant 0 : i32
    return %arg0, %c0_i32, %c0_i32_0 : i32, i32, i32
  }
  func.func @transform_11(%arg0: i32) -> (i32, i32, i32) {
    %c0_i32 = arith.constant 0 : i32
    %c0_i32_0 = arith.constant 0 : i32
    %c0_i32_1 = arith.constant 0 : i32
    return %arg0, %c0_i32, %c0_i32_0 : i32, i32, i32
  }
  func.func @transform_12(%arg0: i32) -> (i32, i32, i32) {
    %c0_i32 = arith.constant 0 : i32
    %c0_i32_0 = arith.constant 0 : i32
    %c0_i32_1 = arith.constant 0 : i32
    return %arg0, %c0_i32, %c0_i32_0 : i32, i32, i32
  }
  func.func @transform_13(%arg0: i32) -> (i32, i32, i32) {
    %c0_i32 = arith.constant 0 : i32
    %c0_i32_0 = arith.constant 0 : i32
    %c0_i32_1 = arith.constant 0 : i32
    return %arg0, %c0_i32, %c0_i32_0 : i32, i32, i32
  }
  func.func @transform_14(%arg0: i32) -> (i32, i32, i32) {
    %c0_i32 = arith.constant 0 : i32
    %c0_i32_0 = arith.constant 0 : i32
    %c0_i32_1 = arith.constant 0 : i32
    return %arg0, %c0_i32, %c0_i32_0 : i32, i32, i32
  }
  func.func @transform_15(%arg0: i32) -> (i32, i32, i32) {
    %c0_i32 = arith.constant 0 : i32
    %c0_i32_0 = arith.constant 0 : i32
    %c0_i32_1 = arith.constant 0 : i32
    return %arg0, %c0_i32, %c0_i32_0 : i32, i32, i32
  }
  func.func @transform_16(%arg0: i32) -> (i32, i32) {
    %c0_i32 = arith.constant 0 : i32
    %c0_i32_0 = arith.constant 0 : i32
    %c0_i32_1 = arith.constant 0 : i32
    return %c0_i32, %c0_i32_0 : i32, i32
  }
}

module attributes {stable_mosaic.version = 11 : i64} {
  func.func @_head_kernel(%arg0: memref<2x32xf32, #tpu.memory_space<vmem>>, %arg1: memref<32x32xf32, #tpu.memory_space<vmem>>, %arg2: memref<1x32xf32, #tpu.memory_space<vmem>>, %arg3: memref<32x32xf32, #tpu.memory_space<vmem>>, %arg4: memref<1x32xf32, #tpu.memory_space<vmem>>, %arg5: memref<32x3xf32, #tpu.memory_space<vmem>>, %arg6: memref<1x3xf32, #tpu.memory_space<vmem>>, %arg7: memref<2x3xf32, #tpu.memory_space<vmem>>) attributes {dimension_semantics = [], scalar_prefetch = 0 : i64, scratch_operands = 0 : i64, tpu.core_type = #tpu.core_type<tc>} {
    %c0 = arith.constant 0 : index
    %c0_0 = arith.constant 0 : index
    %0 = vector.load %arg0[%c0, %c0_0] : memref<2x32xf32, #tpu.memory_space<vmem>>, vector<2x32xf32>
    %c0_1 = arith.constant 0 : index
    %c0_2 = arith.constant 0 : index
    %1 = vector.load %arg1[%c0_1, %c0_2] : memref<32x32xf32, #tpu.memory_space<vmem>>, vector<32x32xf32>
    %c0_3 = arith.constant 0 : index
    %c0_4 = arith.constant 0 : index
    %2 = vector.load %arg2[%c0_3, %c0_4] : memref<1x32xf32, #tpu.memory_space<vmem>>, vector<1x32xf32>
    %c0_5 = arith.constant 0 : index
    %c0_6 = arith.constant 0 : index
    %3 = vector.load %arg3[%c0_5, %c0_6] : memref<32x32xf32, #tpu.memory_space<vmem>>, vector<32x32xf32>
    %c0_7 = arith.constant 0 : index
    %c0_8 = arith.constant 0 : index
    %4 = vector.load %arg4[%c0_7, %c0_8] : memref<1x32xf32, #tpu.memory_space<vmem>>, vector<1x32xf32>
    %c0_9 = arith.constant 0 : index
    %c0_10 = arith.constant 0 : index
    %5 = vector.load %arg5[%c0_9, %c0_10] : memref<32x3xf32, #tpu.memory_space<vmem>>, vector<32x3xf32>
    %c0_11 = arith.constant 0 : index
    %c0_12 = arith.constant 0 : index
    %6 = vector.load %arg6[%c0_11, %c0_12] : memref<1x3xf32, #tpu.memory_space<vmem>>, vector<1x3xf32>
    %cst = arith.constant dense<0.000000e+00> : vector<2x32xf32>
    %7 = tpu.matmul %0, %1, %cst {dimension_numbers = #tpu.dot_dimension_numbers<[1], [0], [0], [1], [0, 0, 1, 1], [], []>} : vector<2x32xf32>, vector<32x32xf32>, vector<2x32xf32> -> vector<2x32xf32>
    %8 = vector.broadcast %2 : vector<1x32xf32> to vector<2x32xf32>
    %9 = arith.addf %7, %8 : vector<2x32xf32>
    %10 = math.tanh %9 : vector<2x32xf32>
    %cst_13 = arith.constant dense<0.000000e+00> : vector<2x32xf32>
    %11 = tpu.matmul %10, %3, %cst_13 {dimension_numbers = #tpu.dot_dimension_numbers<[1], [0], [0], [1], [0, 0, 1, 1], [], []>} : vector<2x32xf32>, vector<32x32xf32>, vector<2x32xf32> -> vector<2x32xf32>
    %12 = vector.broadcast %4 : vector<1x32xf32> to vector<2x32xf32>
    %13 = arith.addf %11, %12 : vector<2x32xf32>
    %14 = math.tanh %13 : vector<2x32xf32>
    %cst_14 = arith.constant dense<0.000000e+00> : vector<2x3xf32>
    %15 = tpu.matmul %14, %5, %cst_14 {dimension_numbers = #tpu.dot_dimension_numbers<[1], [0], [0], [1], [0, 0, 1, 1], [], []>} : vector<2x32xf32>, vector<32x3xf32>, vector<2x3xf32> -> vector<2x3xf32>
    %16 = vector.broadcast %6 : vector<1x3xf32> to vector<2x3xf32>
    %17 = arith.addf %15, %16 : vector<2x3xf32>
    %c0_15 = arith.constant 0 : index
    %c0_16 = arith.constant 0 : index
    %18 = vector.load %arg7[%c0_15, %c0_16] : memref<2x3xf32, #tpu.memory_space<vmem>>, vector<2x3xf32>
    tpu.vector_store %arg7[%c0_15, %c0_16], %17 {strides = array<i32>} : memref<2x3xf32, #tpu.memory_space<vmem>>, vector<2x3xf32>,
    return
  }
}

</mosaic_0001>

<bundles_post_ra>
// kernel: classification_model_forward.3
= control target key start
LH: loop header
LB: loop body
LE: loop exit
PB: predicated region body
PF: predicated region fallthrough
CT: control target
= control target key end

     0   :  { %v382_v1 = vmov 0.0   ;;  %vm383_vm0 = vmmov 0   ;;  %s482_s0 = inlined_call_operand.vmem [shape: f32[2,32], index: 0, kind: input, shape index: {}]   ;;  %s483_s1 = inlined_call_operand.vmem [shape: f32[32,32], index: 1, kind: input, shape index: {}]   ;;  %s484_s2 = inlined_call_operand.vmem [shape: f32[1,32], index: 2, kind: input, shape index: {}]   ;;  %s485_s3 = inlined_call_operand.vmem [shape: f32[32,32], index: 3, kind: input, shape index: {}]   ;;  %s486_s4 = inlined_call_operand.vmem [shape: f32[1,32], index: 4, kind: input, shape index: {}]   ;;  %s487_s5 = inlined_call_operand.vmem [shape: f32[32,3], index: 5, kind: input, shape index: {}]   ;;  %s488_s6 = inlined_call_operand.vmem [shape: f32[1,3], index: 6, kind: input, shape index: {}]   ;;  %s489_s7 = inlined_call_operand.hbm [shape: f32[2,3], index: 7, kind: output, shape index: {}]  }
   0x1   :  { %v31_v0 = vld [vmem:[%s483_s1 + $0x18] sm:$0xff]  ;;  %320 = vmatprep.subr.mxu0 %v382_v1  ;;  %v30_v2 = vld [vmem:[%s483_s1 + $0x10] sm:$0xff]  ;;  %328 = vmatprep.mubr.msk.f32.mxu0 %vm383_vm0, %v382_v1 }
   0x2   :  { %321 = vmatpush3.msra.mxu0 %v31_v0  ;;  %331 = vmatprep.subr.mxu1 %v382_v1 }
   0x3   :  { %12 = vsyncpa [#allocation3], 0  ;;  %322 = vmatprep.subr.mxu0 %v382_v1  ;;  %v29_v3 = vld [vmem:[%s483_s1 + $0x8] sm:$0xff]  ;;  %339 = vmatprep.mubr.msk.f32.mxu1 %vm383_vm0, %v382_v1  ;;  %v28_v4 = vld [vmem:[%s483_s1] sm:$0xff]  ;;  %vm49_vm1 = vcmask 261120   ;;  %s384_s29 = smov [#allocation2]  }
   0x4   :  { %323 = vmatpush3.msra.mxu0 %v30_v2  ;;  %v27_v5 = vld [vmem:[%s482_s0] sm:$0x3]  ;;  %v36_v6 = vld [vmem:[%s485_s3 + $0x18] sm:$0xff]  ;;  %v35_v7 = vld [vmem:[%s485_s3 + $0x10] sm:$0xff]  ;;  %vm283_vm2 = vcmask 17408  }
   0x5   :  { %324 = vmatprep.subr.mxu0 %v382_v1  ;;  %332 = vmatpush3.msra.mxu1 %v36_v6  ;;  %v34_v8 = vld [vmem:[%s485_s3 + $0x8] sm:$0xff]  ;;  %v33_v9 = vld [vmem:[%s485_s3] sm:$0xff]  ;;  %v41_v15 = vld [vmem:[%s487_s5 + $0x18] sm:$0xff] }
   0x6   :  { %325 = vmatpush3.msra.mxu0 %v29_v3  ;;  %333 = vmatprep.subr.mxu1 %v382_v1  ;;  %v299_v10 = vld [vmem:[%s484_s2] ss:$0 sm:$0xff]  ;;  %v40_v16 = vld [vmem:[%s487_s5 + $0x10] sm:$0xff]  ;;  %v39_v17 = vld [vmem:[%s487_s5 + $0x8] sm:$0xff] }
   0x7   :  { %326 = vmatprep.subr.mxu0 %v382_v1  ;;  %334 = vmatpush3.msra.mxu1 %v35_v7  ;;  %v38_v18 = vld [vmem:[%s487_s5] sm:$0xff]  ;;  %s291_s5 = sshll.u32 %s384_s29, 4  ;;  %s292_s5 = int_to_ptr.vmem [resolvable:$true] %s291_s5 }
   0x8   :  { %327 = vmatpush3.msra.mxu0 %v28_v4  ;;  %335 = vmatprep.subr.mxu1 %v382_v1  ;;  %v301_v19 = vld [vmem:[%s486_s4] ss:$0 sm:$0xff]  ;;  %s360_s4 = scalar_lea.vmem %s292_s5, 32  ;;  %p365_p1 = scmp.lt.s32.totalorder %s292_s5, %s292_s5 }
   0x9   :  { %329 = vmatmul.mubr.msk.f32.vlgmr.msra.gmra.mxu0 %vm49_vm1, %v27_v5  ;;  %342 = vmatprep.subr.mxu0 %v382_v1  ;;  %v303_v24 = vld [vmem:[%s488_s6] ss:$0 sm:$0xff]  ;;  %p361_p0 = scmp.ne.s32.totalorder %s292_s5, %s360_s4  ;;  %p366_p2 = scmp.lt.s32.totalorder %s360_s4, %s360_s4 }
   0xa   :  { %350 = vmatprep.mubr.msk.f32.mxu0 %vm383_vm0, %v382_v1  ;;  %336 = vmatpush3.msra.mxu1 %v34_v8 }
   0xb   :  { %337 = vmatprep.subr.mxu1 %v382_v1  ;;  %343 = vmatpush3.msra.mxu0 %v41_v15  ;;  %p367_p3 = por %p366_p2, %p365_p1 }
   0xc   :  { %338 = vmatpush3.msra.mxu1 %v33_v9  ;;  %344 = vmatprep.subr.mxu0 %v382_v1 }
   0xd   :  { %345 = vmatpush3.msra.mxu0 %v40_v16  ;;  %p368_p4 = pnand %p367_p3, %p361_p0 }
   0xe   :  { %346 = vmatprep.subr.mxu0 %v382_v1 }
   0xf   :  { %347 = vmatpush3.msra.mxu0 %v39_v17 }
  0x10   :  { %348 = vmatprep.subr.mxu0 %v382_v1 }
  0x11   :  { %349 = vmatpush3.msra.mxu0 %v38_v18 }
  0xc9   :  { %v119_v11 = vpop.f32.mrf.mxu0 }
  0xca   :  { %v120_v12 = vadd.f32 %v299_v10, %v119_v11 }
  0xcb   :  { %v330_v13 = vpop.f32.mrf.mxu0 }
  0xcc   :  { %356 = vtanh.f32 %v120_v12 }
  0xd9   :  { %v357_v14 = vpop.eup %356 }
  0xda   :  { %340 = vmatmul.mubr.msk.f32.vlgmr.msra.gmra.mxu1 %vm49_vm1, %v357_v14 }
 0x19a   :  { %v199_v20 = vpop.f32.mrf.mxu1 }
 0x19b   :  { %v200_v21 = vadd.f32 %v301_v19, %v199_v20 }
 0x19c   :  { %v341_v22 = vpop.f32.mrf.mxu1 }
 0x19d   :  { %358 = vtanh.f32 %v200_v21 }
 0x1aa   :  { %v359_v23 = vpop.eup %358 }
 0x1ab   :  { %351 = vmatmul.mubr.msk.f32.vlgmr.msra.gmra.mxu0 %vm49_vm1, %v359_v23 }
 0x26b   :  { %v279_v25 = vpop.f32.mrf.mxu0 }
 0x26c   :  { %v280_v26 = vadd.f32 %v303_v24, %v279_v25 }
 0x26d   :  { %v352_v27 = vpop.f32.mrf.mxu0 }
 0x26e   :  { %284 = vst.msk [vmem:[#allocation2] sm:$0x3] %vm283_vm2, %v280_v26 }
 0x26f   :  { %371 = shalt.err (!%p368_p4)
}
 0x270   :  { %294 = dma.vmem_to_hbm [thread:$0]  %s292_s5, 32, %s489_s7, [#allocation3]  }
 0x271   :  { %380 = dma.done.wait [#allocation3], 32  }
 0x272   :  { %381 = vsyncadd [#allocation3], 4294967264 }
 0x273   :  { %298 = vsyncpa [#allocation3], 1 }

// kernel: classification_model_forward.2
= control target key start
LH: loop header
LB: loop body
LE: loop exit
PB: predicated region body
PF: predicated region fallthrough
CT: control target
= control target key end

     0   :  { %s2173_s21 = smov 0   ;;  %s2414_s0 = inlined_call_operand.vmem [shape: f32[16,32], index: 0, kind: input, shape index: {}]   ;;  %s2415_s1 = inlined_call_operand.vmem [shape: f32[16,16], index: 1, kind: input, shape index: {}]   ;;  %s2416_s2 = inlined_call_operand.vmem [shape: f32[1,32], index: 2, kind: input, shape index: {}]   ;;  %s2417_s3 = inlined_call_operand.vmem [shape: f32[1,32], index: 3, kind: input, shape index: {}]   ;;  %s2418_s4 = inlined_call_operand.vmem [shape: f32[2,32,96], index: 4, kind: input, shape index: {}]   ;;  %s2419_s5 = inlined_call_operand.vmem [shape: f32[2,1,96], index: 5, kind: input, shape index: {}]   ;;  %s2420_s6 = inlined_call_operand.vmem [shape: f32[2,32,32], index: 6, kind: input, shape index: {}]   ;;  %s2421_s7 = inlined_call_operand.vmem [shape: f32[2,1,32], index: 7, kind: input, shape index: {}]   ;;  %s2422_s8 = inlined_call_operand.vmem [shape: f32[2,1,32], index: 8, kind: input, shape index: {}]   ;;  %s2423_s9 = inlined_call_operand.vmem [shape: f32[2,1,32], index: 9, kind: input, shape index: {}]   ;;  %s2424_s10 = inlined_call_operand.vmem [shape: f32[2,32,64], index: 10, kind: input, shape index: {}]   ;;  %s2425_s11 = inlined_call_operand.vmem [shape: f32[2,1,64], index: 11, kind: input, shape index: {}]   ;;  %s2426_s12 = inlined_call_operand.vmem [shape: f32[2,64,32], index: 12, kind: input, shape index: {}]   ;;  %s2427_s13 = inlined_call_operand.vmem [shape: f32[2,1,32], index: 13, kind: input, shape index: {}]   ;;  %s2428_s14 = inlined_call_operand.vmem [shape: f32[2,1,32], index: 14, kind: input, shape index: {}]   ;;  %s2429_s15 = inlined_call_operand.vmem [shape: f32[2,1,32], index: 15, kind: input, shape index: {}]   ;;  %s2430_s16 = inlined_call_operand.vmem [shape: f32[16,32], index: 16, kind: output, shape index: {}]  }
   0x1   :  { %2437 = sst [smem:[#allocation4_spill]] %s2414_s0 }
   0x2   :  { %2438 = sst [smem:[#allocation5_spill]] %s2415_s1 }
   0x3   :  { %2439 = sst [smem:[#allocation6_spill]] %s2417_s3 }
   0x4   :  { %2440 = sst [smem:[#allocation7_spill]] %s2418_s4 }
   0x5   :  { %2441 = sst [smem:[#allocation8_spill]] %s2420_s6 }
   0x6   :  { %2442 = sst [smem:[#allocation9_spill]] %s2430_s16 }
   0x7 LB: > { %2443 = sst [smem:[#allocation2_spill]] %s2081_s21  ;;  %s1850_s22 = sadd.s32 4294967295, %s2081_s21   ;;  %s2081_s21 = sphi %s2173_s21, %s26_s21  }
   0x8   : > { %p1853_p0 = scmp.ge.s32.totalorder %s2081_s21, 1  ;;  %p551_p1 = scmp.lt.s32.totalorder %s2081_s21, 3 }
   0xa   : > { %p552_p2 = pnand %p1853_p0, %p551_p1 }
   0xc   : > { %555 = sbr.rel (%p552_p2) target bundleno = 2683 (0xa7b), region = 84 }
  0x11   : > { %p635_p3 = scmp.lt.s32.totalorder %s1850_s22, 1  ;;  %s2444_s4 = sld [smem:[#allocation7_spill]] }
  0x12   : > { %s2445_s6 = sld [smem:[#allocation8_spill]]  ;;  %p1862_p4 = scmp.ne.s32.totalorder %s1850_s22, 0 }
  0x13   : > { %s2181_s23 = scalar_select %p635_p3, %s1850_s22, 1 }
  0x14   : > { %s2448_s16 = sld [smem:[#allocation6_spill]] (!%p1862_p4) }
  0x15   : > { %s1897_s24 = sshll.u32 %s2181_s23, 5  ;;  %s672_s25 = scalar_lea.vmem %s2427_s13, %s2181_s23 }
  0x16   : > { %s675_s28 = scalar_lea.vmem %s2428_s14, %s2181_s23  ;;  %s678_s3 = scalar_lea.vmem %s2429_s15, %s2181_s23 }
  0x17   : > { %s2191_s30 = scalar_lea.vmem %s2444_s4, %s1897_s24  ;;  %s2213_s4 = scalar_lea.vmem %s2424_s10, %s1897_s24 }
  0x18   : > { %s2196_s18 = scalar_lea.vmem %s2445_s6, %s1897_s24  ;;  %682 = sbr.rel (%p1862_p4) target bundleno = 346 (0x15a), region = 88 }
  0x19   : > { %2446 = sst [smem:[#allocation3_spill]] %s2196_s18  ;;  %s1900_s18 = sshll.u32 %s2181_s23, 6 }
  0x1a   : > { %s2223_s21 = scalar_lea.vmem %s2426_s12, %s1900_s18  ;;  %s2447_s6 = sld [smem:[#allocation4_spill]] (!%p1862_p4) }
  0x1b   : > { %s2449_s29 = sld [smem:[#allocation9_spill]] (!%p1862_p4) }
  0x1d   : > { %vm687_vm0 = vcmask 261120   ;;  %v1863_v21 = vld [vmem:[%s2416_s2] ss:$0 sm:$0xff] }
  0x1e   : > { %v1864_v23 = vld [vmem:[%s2448_s16] ss:$0 sm:$0xff] }
  0x20   : > { %v683_v0 = vld [vmem:[%s2447_s6] sm:$0xff]  ;;  %v684_v1 = vld [vmem:[%s2447_s6 + $0x8] sm:$0xff] }
  0x21   : > { %v688_v2 = vsel %vm687_vm0, %v683_v0, 0.0  ;;  %v691_v3 = vsel %vm687_vm0, %v684_v1, 0.0 }
  0x22   : > { %689 = vadd.xlane.f32.xlu0 %v688_v2 }
  0x26   : > { %692 = vadd.xlane.f32.xlu0 %v691_v3 }
  0xab   : > { %v690_v4 = vpop.xlane.xlu0 %689 }
  0xac   : > { %v695_v5 = vmul.f32 0.03125, %v690_v4 }
  0xae   : > { %v697_v6 = vsub.f32 %v683_v0, %v695_v5 }
  0xaf   : > { %v693_v7 = vpop.xlane.xlu0 %692 }
  0xb0   : > { %v696_v8 = vmul.f32 0.03125, %v693_v7  ;;  %v699_v9 = vmul.f32 %v697_v6, %v697_v6 }
  0xb2   : > { %v698_v10 = vsub.f32 %v684_v1, %v696_v8  ;;  %v701_v11 = vsel %vm687_vm0, %v699_v9, 0.0 }
  0xb3   : > { %702 = vadd.xlane.f32.xlu1 %v701_v11 }
  0xb4   : > { %v700_v12 = vmul.f32 %v698_v10, %v698_v10 }
  0xb6   : > { %v704_v13 = vsel %vm687_vm0, %v700_v12, 0.0 }
  0xb7   : > { %705 = vadd.xlane.f32.xlu1 %v704_v13 }
 0x13c   : > { %v703_v14 = vpop.xlane.xlu1 %702 }
 0x13d   : > { %v707_v15 = vmul.f32 0.03125, %v703_v14 }
 0x13f   : > { %v709_v16 = vadd.f32 1e-12, %v707_v15 }
 0x140   : > { %v706_v17 = vpop.xlane.xlu1 %705 }
 0x141   : > { %2043 = vrsqrt.f32 %v709_v16  ;;  %v708_v18 = vmul.f32 0.03125, %v706_v17 }
 0x143   : > { %v710_v19 = vadd.f32 1e-12, %v708_v18 }
 0x145   : > { %2045 = vrsqrt.f32 %v710_v19 }
 0x14e   : > { %v2044_v20 = vpop.eup %2043 }
 0x14f   : > { %v713_v22 = vmul.f32 %v2044_v20, %v697_v6 }
 0x151   : > { %v721_v24 = vmul.f32 %v1863_v21, %v713_v22 }
 0x152   : > { %v2046_v25 = vpop.eup %2045 }
 0x153   : > { %v729_v26 = vadd.f32 %v1864_v23, %v721_v24  ;;  %v714_v27 = vmul.f32 %v2046_v25, %v698_v10 }
 0x155   : > { %731 = vst.msk [vmem:[%s2449_s29] sm:$0xff] %vm687_vm0, %v729_v26  ;;  %v722_v28 = vmul.f32 %v1863_v21, %v714_v27 }
 0x157   : > { %v730_v29 = vadd.f32 %v1864_v23, %v722_v28 }
 0x159   : > { %732 = vst.msk [vmem:[%s2449_s29 + $0x8] sm:$0xff] %vm687_vm0, %v730_v29 }
 0x15a PF: > { %v740_v30 = vld [vmem:[%s2191_s30 + $0x18] sm:$0xff]  ;;  %v739_v31 = vld [vmem:[%s2191_s30 + $0x10] sm:$0xff]  ;;  %vm748_vm1 = vcmask 261120   ;;  %s2450_s22 = sld [smem:[#allocation9_spill]]  ;;  %v738_v33 = vld [vmem:[%s2191_s30 + $0x8] sm:$0xff]  ;;  %s2451_s26 = scalar_lea.vmem %s2419_s5, %s2181_s23  ;;  %vm840_vm2 = vcmask 130048  }
 0x15b   : > { %1947 = vmatprep.subr.mxu0 %v740_v30  ;;  %v737_v34 = vld [vmem:[%s2191_s30] sm:$0xff]  ;;  %s2083_s30 = smov 80   ;;  %s2084_s24 = smov 96   ;;  %vm1584_vm3 = vcmask 523264  }
 0x15c   : > { %1948 = vmatpush3.msra.mxu0 %v740_v30  ;;  %v1865_v36 = vld [vmem:[%s2451_s26] ss:$0 sm:$0xff]  ;;  %s2085_s29 = smov 112   ;;  %s2452_s18 = sld [smem:[#allocation5_spill]] }
 0x15d   : > { %1949 = vmatprep.subr.mxu0 %v739_v31  ;;  %s2086_s20 = smov 64   ;;  %s2087_s1 = smov 48  }
 0x15e   : > { %1950 = vmatpush3.msra.mxu0 %v739_v31  ;;  %s2453_s16 = sld [smem:[#allocation3_spill]]  ;;  %s2455_s17 = scalar_lea.vmem %s2422_s8, %s2181_s23 }
 0x15f   : > { %1951 = vmatprep.subr.mxu0 %v738_v33  ;;  %s2456_s27 = scalar_lea.vmem %s2423_s9, %s2181_s23 }
 0x160   : > { %v2266_v32 = vld [vmem:[%s2450_s22] sm:$0xff]  ;;  %1952 = vmatpush3.msra.mxu0 %v738_v33  ;;  %v2275_v35 = vld [vmem:[%s2450_s22 + $0x8] sm:$0xff] }
 0x161   : > { %1955 = vmatprep.mubr.msk.f32.mxu0 %vm748_vm1, %v2266_v32  ;;  %1953 = vmatprep.subr.mxu0 %v737_v34 }
 0x162   : > { %1954 = vmatpush3.msra.mxu0 %v737_v34  ;;  %v736_v48 = vld [vmem:[%s2452_s18 + $0x8] sm:$0xff]  ;;  %v735_v51 = vld [vmem:[%s2452_s18] sm:$0xff] }
 0x163   : > { %1956 = vmatmul.mubr.msk.f32.vlgmr.msra.gmra.mxu0 %vm748_vm1, %v2275_v35 }
 0x223   : > { %v1957_v37 = vpop.f32.mrf.mxu0 }
 0x224   : > { %v2284_v38 = vadd.f32 %v1957_v37, %v1865_v36 }
 0x225   : > { %v821_v39 = vpop.f32.mrf.mxu0 }
 0x226   : > { %v2286_v40 = vadd.f32 %v1865_v36, %v821_v39  ;;  %1043 = vrot.lane.b32.xlu1 %v2284_v38, %s2083_s30  ;;  %838 = vrot.lane.b32.xlu0 %v2284_v38, %s2084_s24  ;;  %v833_v39 = vld [vmem:[%s2453_s16 + $0x18] sm:$0xff] }
 0x228   : > { %1962 = vmatprep.mubr.msk.f32.mxu1 %vm840_vm2, %v2286_v40 }
 0x22a   : > { %1041 = vrot.lane.b32.xlu1 %v2286_v40, %s2083_s30  ;;  %836 = vrot.lane.b32.xlu0 %v2286_v40, %s2084_s24  ;;  %s2454_s24 = scalar_lea.vmem %s2421_s7, %s2181_s23 }
 0x22e   : > { %1039 = vrot.lane.b32.xlu1 %v2284_v38, %s2085_s29  ;;  %1037 = vrot.lane.b32.xlu0 %v2286_v40, %s2085_s29 }
 0x298   : > { %v839_v41 = vpop.permute.xlu0 %838  ;;  %v1044_v42 = vpop.permute.xlu1 %1043 }
 0x299   : > { %1958 = vmatprep.subr.msk.mxu1 %vm840_vm2, %v839_v41 }
 0x29a   : > { %1959 = vmatpush3.xpose.msk.msra.mxu1 %vm840_vm2, %v839_v41  ;;  %v831_v41 = vld [vmem:[%s2453_s16 + $0x8] sm:$0xff] }
 0x29c   : > { %v837_v43 = vpop.permute.xlu0 %836  ;;  %v1042_v45 = vpop.permute.xlu1 %1041 }
 0x29d   : > { %1960 = vmatprep.subr.msk.mxu1 %vm840_vm2, %v837_v43 }
 0x29e   : > { %1961 = vmatpush3.xpose.msk.msra.mxu1 %vm840_vm2, %v837_v43 }
 0x29f   : > { %1972 = vmatprep.subr.msk.mxu1 %vm840_vm2, %v1044_v42 }
 0x2a0   : > { %v1038_v44 = vpop.permute.xlu0 %1037  ;;  %v1040_v46 = vpop.permute.xlu1 %1039 }
 0x2a1   : > { %1963 = vmatmul.mubr.msk.f32.vlgmr.msra.gmra.mxu1 %vm840_vm2, %v2284_v38 }
 0x2a2   : > { %1973 = vmatpush3.xpose.msk.msra.mxu1 %vm840_vm2, %v1044_v42  ;;  %1976 = vmatprep.mubr.msk.f32.mxu1 %vm840_vm2, %v1038_v44 }
 0x2a3   : > { %1974 = vmatprep.subr.msk.mxu1 %vm840_vm2, %v1042_v45 }
 0x2a6   : > { %1975 = vmatpush3.xpose.msk.msra.mxu1 %vm840_vm2, %v1042_v45 }
 0x2a9   : > { %1977 = vmatmul.mubr.msk.f32.vlgmr.msra.gmra.mxu1 %vm840_vm2, %v1040_v46  ;;  %v830_v46 = vld [vmem:[%s2453_s16] sm:$0xff] }
 0x361   : > { %v1964_v47 = vpop.f32.mrf.mxu1 }
 0x362   : > { %v925_v49 = vmul.f32 0.25, %v1964_v47 }
 0x363   : > { %v915_v50 = vpop.f32.mrf.mxu1 }
 0x364   : > { %v924_v52 = vmul.f32 0.25, %v915_v50  ;;  %v927_v53 = vadd.f32 %v925_v49, %v736_v48  ;;  %v1884_v50 = vld [vmem:[%s2454_s24] ss:$0 sm:$0xff] }
 0x366   : > { %v931_v54 = vsel %vm840_vm2, %v927_v53, -inf  ;;  %v926_v55 = vadd.f32 %v924_v52, %v735_v51 }
 0x367   : > { %932 = vmax.xlane.f32.xlu1 %v931_v54 }
 0x368   : > { %v928_v56 = vsel %vm840_vm2, %v926_v55, -inf }
 0x369   : > { %v1978_v57 = vpop.f32.mrf.mxu1  ;;  %929 = vmax.xlane.f32.xlu0 %v928_v56 }
 0x36a   : > { %v1129_v59 = vmul.f32 0.25, %v1978_v57 }
 0x36b   : > { %v1119_v58 = vpop.f32.mrf.mxu1 }
 0x36c   : > { %v1128_v60 = vmul.f32 0.25, %v1119_v58  ;;  %v1131_v63 = vadd.f32 %v1129_v59, %v736_v48 }
 0x36e   : > { %v1130_v61 = vadd.f32 %v1128_v60, %v735_v51  ;;  %v1135_v0 = vsel %vm840_vm2, %v1131_v63, -inf }
 0x370   : > { %v1132_v62 = vsel %vm840_vm2, %v1130_v61, -inf }
 0x371   : > { %1133 = vmax.xlane.f32.xlu0 %v1132_v62 }
 0x375   : > { %1136 = vmax.xlane.f32.xlu0 %v1135_v0 }
 0x378   : > { %952 = vrot.lane.b32.xlu1 %v2284_v38, %s2086_s20 }
 0x3f0   : > { %v933_v1 = vpop.xlane.xlu1 %932 }
 0x3f1   : > { %v935_v2 = vsub.f32 %v927_v53, %v933_v1 }
 0x3f2   : > { %v930_v3 = vpop.xlane.xlu0 %929 }
 0x3f3   : > { %v938_v4 = vmul.f32 1.442695, %v935_v2  ;;  %v934_v5 = vsub.f32 %v926_v55, %v930_v3 }
 0x3f4   : > { %v953_v6 = vpop.permute.xlu1 %952 }
 0x3f5   : > { %2047 = vpow2.f32 %v938_v4  ;;  %v936_v7 = vmul.f32 1.442695, %v934_v5  ;;  %1965 = vmatprep.subr.mxu0 %v953_v6  ;;  %v1462_v4 = vld [vmem:[%s2213_s4 + $0x18] sm:$0xff]  ;;  %v1461_v5 = vld [vmem:[%s2213_s4 + $0x10] sm:$0xff] }
 0x3f6   : > { %1966 = vmatpush3.msra.mxu0 %v953_v6  ;;  %v1460_v6 = vld [vmem:[%s2213_s4 + $0x8] sm:$0xff] }
 0x3f7   : > { %2049 = vpow2.f32 %v936_v7  ;;  %v1459_v7 = vld [vmem:[%s2213_s4] sm:$0xff] }
 0x3fa   : > { %v1134_v8 = vpop.xlane.xlu0 %1133 }
 0x3fb   : > { %v1138_v18 = vsub.f32 %v1130_v61, %v1134_v8 }
 0x3fd   : > { %v1140_v19 = vmul.f32 1.442695, %v1138_v18 }
 0x3fe   : > { %v1137_v9 = vpop.xlane.xlu0 %1136 }
 0x3ff   : > { %v1139_v10 = vsub.f32 %v1131_v63, %v1137_v9 }
 0x401   : > { %v1142_v11 = vmul.f32 1.442695, %v1139_v10 }
 0x402   : > { %v2048_v12 = vpop.eup %2047 }
 0x403   : > { %2051 = vpow2.f32 %v1142_v11  ;;  %v943_v13 = vsel %vm840_vm2, %v2048_v12, 0.0 }
 0x404   : > { %v2050_v14 = vpop.eup %2049  ;;  %944 = vadd.xlane.f32.xlu0 %v943_v13  ;;  %2053 = vpow2.f32 %v1140_v19 }
 0x405   : > { %v940_v15 = vsel %vm840_vm2, %v2050_v14, 0.0 }
 0x406   : > { %941 = vadd.xlane.f32.xlu1 %v940_v15  ;;  %v1885_v15 = vld [vmem:[%s2455_s17] ss:$0 sm:$0xff] }
 0x410   : > { %v2052_v16 = vpop.eup %2051 }
 0x411   : > { %v1147_v17 = vsel %vm840_vm2, %v2052_v16, 0.0  ;;  %v2054_v20 = vpop.eup %2053 }
 0x412   : > { %1148 = vadd.xlane.f32.xlu0 %v1147_v17  ;;  %v1144_v21 = vsel %vm840_vm2, %v2054_v20, 0.0  ;;  %v1886_v17 = vld [vmem:[%s2456_s27] ss:$0 sm:$0xff] }
 0x417   : > { %1156 = vrot.lane.b32.xlu1 %v2284_v38, %s2087_s1 }
 0x428   : > { %950 = vrot.lane.b32.xlu0 %v2286_v40, %s2086_s20 }
 0x43b   : > { %1145 = vadd.xlane.f32.xlu1 %v1144_v21 }
 0x44c   : > { %1154 = vrot.lane.b32.xlu1 %v2286_v40, %s2087_s1  ;;  %v832_v40 = vld [vmem:[%s2453_s16 + $0x10] sm:$0xff]  ;;  %s2457_s16 = scalar_lea.vmem %s2425_s11, %s2181_s23 }
 0x48d   : > { %v945_v22 = vpop.xlane.xlu0 %944 }
 0x48e   : > { %2055 = vrcp.f32 %v945_v22 }
 0x48f   : > { %v942_v23 = vpop.xlane.xlu1 %941 }
 0x490   : > { %2057 = vrcp.f32 %v942_v23 }
 0x493   : > { %v1157_v30 = vpop.permute.xlu1 %1156 }
 0x49b   : > { %v1149_v24 = vpop.xlane.xlu0 %1148  ;;  %v2056_v25 = vpop.eup %2055 }
 0x49c   : > { %v949_v29 = vmul.f32 %v2056_v25, %v2048_v12  ;;  %2059 = vrcp.f32 %v1149_v24  ;;  %v1576_v24 = vld [vmem:[%s2223_s21 + $0x38] sm:$0xff]  ;;  %v1575_v25 = vld [vmem:[%s2223_s21 + $0x30] sm:$0xff] }
 0x49d   : > { %v2058_v26 = vpop.eup %2057  ;;  %2011 = vmatprep.subr.mxu1 %v1576_v24 }
 0x49e   : > { %v948_v27 = vmul.f32 %v2058_v26, %v2050_v14  ;;  %2012 = vmatpush3.msra.mxu1 %v1576_v24  ;;  %v1574_v26 = vld [vmem:[%s2223_s21 + $0x28] sm:$0xff] }
 0x49f   : > { %v951_v28 = vpop.permute.xlu0 %950  ;;  %2013 = vmatprep.subr.mxu1 %v1575_v25 }
 0x4a0   : > { %1967 = vmatprep.subr.mxu0 %v951_v28  ;;  %1969 = vmatprep.mubr.msk.f32.mxu0 %vm840_vm2, %v948_v27  ;;  %v1573_v27 = vld [vmem:[%s2223_s21 + $0x20] sm:$0xff] }
 0x4a1   : > { %1968 = vmatpush3.msra.mxu0 %v951_v28  ;;  %2014 = vmatpush3.msra.mxu1 %v1575_v25  ;;  %v1572_v28 = vld [vmem:[%s2223_s21 + $0x18] sm:$0xff] }
 0x4a2   : > { %1970 = vmatmul.mubr.msk.f32.vlgmr.msra.gmra.mxu0 %vm840_vm2, %v949_v29  ;;  %1979 = vmatprep.subr.mxu0 %v1157_v30  ;;  %v1571_v29 = vld [vmem:[%s2223_s21 + $0x10] sm:$0xff] }
 0x4a3   : > { %1980 = vmatpush3.msra.mxu0 %v1157_v30  ;;  %2015 = vmatprep.subr.mxu1 %v1574_v26  ;;  %v1570_v30 = vld [vmem:[%s2223_s21 + $0x8] sm:$0xff] }
 0x4a4   : > { %2016 = vmatpush3.msra.mxu1 %v1574_v26 }
 0x4a5   : > { %2017 = vmatprep.subr.mxu1 %v1573_v27 }
 0x4a6   : > { %2018 = vmatpush3.msra.mxu1 %v1573_v27 }
 0x4a7   : > { %2019 = vmatprep.subr.mxu1 %v1572_v28 }
 0x4a8   : > { %2020 = vmatpush3.msra.mxu1 %v1572_v28 }
 0x4a9   : > { %v2060_v34 = vpop.eup %2059  ;;  %2021 = vmatprep.subr.mxu1 %v1571_v29 }
 0x4aa   : > { %v1153_v38 = vmul.f32 %v2060_v34, %v2052_v16  ;;  %2022 = vmatpush3.msra.mxu1 %v1571_v29 }
 0x4ab   : > { %2023 = vmatprep.subr.mxu1 %v1570_v30 }
 0x4ac   : > { %2024 = vmatpush3.msra.mxu1 %v1570_v30 }
 0x4c4   : > { %v1146_v31 = vpop.xlane.xlu1 %1145 }
 0x4c5   : > { %2061 = vrcp.f32 %v1146_v31  ;;  %v1569_v31 = vld [vmem:[%s2223_s21] sm:$0xff] }
 0x4c6   : > { %2025 = vmatprep.subr.mxu1 %v1569_v31 }
 0x4c7   : > { %2026 = vmatpush3.msra.mxu1 %v1569_v31 }
 0x4c8   : > { %v1155_v33 = vpop.permute.xlu1 %1154 }
 0x4c9   : > { %1981 = vmatprep.subr.mxu0 %v1155_v33 }
 0x4ca   : > { %1982 = vmatpush3.msra.mxu0 %v1155_v33  ;;  %v1887_v33 = vld [vmem:[%s2457_s16] ss:$0 sm:$0xff] }
 0x4cb   : > { %1986 = vmatprep.subr.mxu0 %v833_v39 }
 0x4d2   : > { %v2062_v36 = vpop.eup %2061 }
 0x4d3   : > { %v1152_v37 = vmul.f32 %v2062_v36, %v2054_v20 }
 0x4d5   : > { %1983 = vmatprep.mubr.msk.f32.mxu0 %vm840_vm2, %v1152_v37 }
 0x4d6   : > { %1984 = vmatmul.mubr.msk.f32.vlgmr.msra.gmra.mxu0 %vm840_vm2, %v1153_v38 }
 0x4d7   : > { %1987 = vmatpush3.msra.mxu0 %v833_v39 }
 0x4d8   : > { %1988 = vmatprep.subr.mxu0 %v832_v40 }
 0x4d9   : > { %1989 = vmatpush3.msra.mxu0 %v832_v40 }
 0x4da   : > { %1993 = vmatprep.subr.mxu0 %v831_v41 }
 0x562   : > { %v1971_v42 = vpop.f32.mrf.mxu0 }
 0x564   : > { %v1028_v43 = vpop.f32.mrf.mxu0 }
 0x596   : > { %v1985_v44 = vpop.f32.mrf.mxu0 }
 0x598   : > { %v1232_v45 = vpop.f32.mrf.mxu0 }
 0x599   : > { %1990 = vmatprep.mubr.msk.f32.mxu0 %vm840_vm2, %v1232_v45 }
 0x59a   : > { %1991 = vmatmul.mubr.msk.f32.vlgmr.msra.gmra.mxu0 %vm840_vm2, %v1985_v44 }
 0x59b   : > { %1994 = vmatpush3.msra.mxu0 %v831_v41  ;;  %1997 = vmatprep.mubr.msk.f32.mxu0 %vm840_vm2, %v1028_v43 }
 0x59c   : > { %1995 = vmatprep.subr.mxu0 %v830_v46 }
 0x59d   : > { %1996 = vmatpush3.msra.mxu0 %v830_v46 }
 0x59e   : > { %1998 = vmatmul.mubr.msk.f32.vlgmr.msra.gmra.mxu0 %vm840_vm2, %v1971_v42  ;;  %2000 = vmatprep.subr.mxu0 %v1462_v4 }
 0x59f   : > { %2001 = vmatpush3.msra.mxu0 %v1462_v4 }
 0x5a0   : > { %2002 = vmatprep.subr.mxu0 %v1461_v5 }
 0x5a1   : > { %2003 = vmatpush3.msra.mxu0 %v1461_v5 }
 0x5a2   : > { %2004 = vmatprep.subr.mxu0 %v1460_v6 }
 0x5a3   : > { %2005 = vmatpush3.msra.mxu0 %v1460_v6 }
 0x5a4   : > { %2006 = vmatprep.subr.mxu0 %v1459_v7 }
 0x5a5   : > { %2007 = vmatpush3.msra.mxu0 %v1459_v7 }
 0x65a   : > { %v1992_v47 = vpop.f32.mrf.mxu0 }
 0x65c   : > { %v1313_v48 = vpop.f32.mrf.mxu0 }
 0x65e   : > { %v1999_v49 = vpop.f32.mrf.mxu0 }
 0x65f   : > { %v1400_v51 = vadd.f32 %v1999_v49, %v1992_v47 }
 0x660   : > { %v1394_v52 = vpop.f32.mrf.mxu0 }
 0x661   : > { %v1411_v53 = vadd.f32 %v1884_v50, %v1400_v51  ;;  %v1395_v54 = vadd.f32 %v1394_v52, %v1313_v48 }
 0x663   : > { %v1410_v55 = vadd.f32 %v1884_v50, %v1395_v54  ;;  %v1413_v56 = vadd.f32 %v1411_v53, %v2275_v35 }
 0x665   : > { %v1419_v57 = vsel %vm748_vm1, %v1413_v56, 0.0  ;;  %v1412_v58 = vadd.f32 %v1410_v55, %v2266_v32 }
 0x666   : > { %1420 = vadd.xlane.f32.xlu1 %v1419_v57  ;;  %v1890_v57 = vld [vmem:[%s672_s25] ss:$0 sm:$0xff] }
 0x667   : > { %v1416_v59 = vsel %vm748_vm1, %v1412_v58, 0.0 }
 0x668   : > { %1417 = vadd.xlane.f32.xlu0 %v1416_v59 }
 0x6ef   : > { %v1421_v60 = vpop.xlane.xlu1 %1420 }
 0x6f0   : > { %v1424_v61 = vmul.f32 0.03125, %v1421_v60 }
 0x6f1   : > { %v1418_v62 = vpop.xlane.xlu0 %1417 }
 0x6f2   : > { %v1423_v63 = vmul.f32 0.03125, %v1418_v62  ;;  %v1426_v0 = vsub.f32 %v1413_v56, %v1424_v61 }
 0x6f4   : > { %v1425_v1 = vsub.f32 %v1412_v58, %v1423_v63  ;;  %v1428_v3 = vmul.f32 %v1426_v0, %v1426_v0 }
 0x6f6   : > { %v1427_v2 = vmul.f32 %v1425_v1, %v1425_v1  ;;  %v1432_v32 = vsel %vm748_vm1, %v1428_v3, 0.0 }
 0x6f8   : > { %v1429_v35 = vsel %vm748_vm1, %v1427_v2, 0.0 }
 0x6f9   : > { %1430 = vadd.xlane.f32.xlu0 %v1429_v35 }
 0x6fd   : > { %1433 = vadd.xlane.f32.xlu0 %v1432_v32 }
 0x782   : > { %v1431_v8 = vpop.xlane.xlu0 %1430 }
 0x783   : > { %v1435_v9 = vmul.f32 0.03125, %v1431_v8 }
 0x785   : > { %v1437_v10 = vadd.f32 1e-12, %v1435_v9 }
 0x786   : > { %v1434_v11 = vpop.xlane.xlu0 %1433 }
 0x787   : > { %2063 = vrsqrt.f32 %v1437_v10  ;;  %v1436_v12 = vmul.f32 0.03125, %v1434_v11 }
 0x789   : > { %v1438_v13 = vadd.f32 1e-12, %v1436_v12 }
 0x78b   : > { %2065 = vrsqrt.f32 %v1438_v13 }
 0x794   : > { %v2064_v14 = vpop.eup %2063 }
 0x795   : > { %v1441_v16 = vmul.f32 %v2064_v14, %v1425_v1 }
 0x797   : > { %v1449_v18 = vmul.f32 %v1885_v15, %v1441_v16 }
 0x798   : > { %v2066_v19 = vpop.eup %2065 }
 0x799   : > { %v1442_v20 = vmul.f32 %v2066_v19, %v1426_v0  ;;  %v2365_v21 = vadd.f32 %v1886_v17, %v1449_v18 }
 0x79b   : > { %v1450_v22 = vmul.f32 %v1885_v15, %v1442_v20  ;;  %2008 = vmatprep.mubr.msk.f32.mxu0 %vm748_vm1, %v2365_v21  ;;  %v1894_v20 = vld [vmem:[%s678_s3] ss:$0 sm:$0xff] }
 0x79d   : > { %v1458_v23 = vadd.f32 %v1886_v17, %v1450_v22  ;;  %v1893_v17 = vld [vmem:[%s675_s28] ss:$0 sm:$0xff] }
 0x79f   : > { %2009 = vmatmul.mubr.msk.f32.vlgmr.msra.gmra.mxu0 %vm748_vm1, %v1458_v23 }
 0x85f   : > { %v2010_v34 = vpop.f32.mrf.mxu0 }
 0x860   : > { %v1548_v36 = vadd.f32 %v2010_v34, %v1887_v33 }
 0x861   : > { %v1542_v37 = vpop.f32.mrf.mxu0 }
 0x862   : > { %v1554_v38 = vmul.f32 0.044715, %v1548_v36  ;;  %v1556_v39 = vmul.f32 %v1548_v36, %v1548_v36  ;;  %v1543_v40 = vadd.f32 %v1887_v33, %v1542_v37  ;;  %v1552_v54 = vmul.f32 0.5, %v1548_v36 }
 0x864   : > { %v1558_v41 = vmul.f32 %v1556_v39, %v1554_v38  ;;  %v1553_v42 = vmul.f32 0.044715, %v1543_v40  ;;  %v1555_v43 = vmul.f32 %v1543_v40, %v1543_v40  ;;  %v1551_v52 = vmul.f32 0.5, %v1543_v40 }
 0x866   : > { %v1560_v44 = vadd.f32 %v1558_v41, %v1548_v36  ;;  %v1557_v45 = vmul.f32 %v1555_v43, %v1553_v42 }
 0x868   : > { %v1562_v46 = vmul.f32 0.7978846, %v1560_v44  ;;  %v1559_v47 = vadd.f32 %v1557_v45, %v1543_v40 }
 0x86a   : > { %2067 = vtanh.f32 %v1562_v46  ;;  %v1561_v48 = vmul.f32 0.7978846, %v1559_v47 }
 0x86c   : > { %2069 = vtanh.f32 %v1561_v48 }
 0x877   : > { %v2068_v49 = vpop.eup %2067 }
 0x878   : > { %v1566_v51 = vadd.f32 1.0, %v2068_v49 }
 0x879   : > { %v2070_v50 = vpop.eup %2069 }
 0x87a   : > { %v1565_v53 = vadd.f32 1.0, %v2070_v50  ;;  %v1568_v56 = vmul.f32 %v1566_v51, %v1552_v54 }
 0x87c   : > { %v1567_v55 = vmul.f32 %v1565_v53, %v1551_v52 }
 0x87e   : > { %2027 = vmatprep.mubr.msk.f32.mxu1 %vm1584_vm3, %v1567_v55 }
 0x87f   : > { %2028 = vmatmul.mubr.msk.f32.vlgmr.msra.gmra.mxu1 %vm1584_vm3, %v1568_v56 }
 0x93f   : > { %v2029_v58 = vpop.f32.mrf.mxu1 }
 0x940   : > { %v1663_v59 = vadd.f32 %v2029_v58, %v1890_v57 }
 0x941   : > { %v1657_v60 = vpop.f32.mrf.mxu1 }
 0x942   : > { %v1658_v61 = vadd.f32 %v1890_v57, %v1657_v60  ;;  %v1667_v62 = vadd.f32 %v1663_v59, %v1458_v23 }
 0x944   : > { %v1673_v63 = vsel %vm748_vm1, %v1667_v62, 0.0  ;;  %v1666_v0 = vadd.f32 %v1658_v61, %v2365_v21 }
 0x945   : > { %1674 = vadd.xlane.f32.xlu0 %v1673_v63 }
 0x946   : > { %v1670_v1 = vsel %vm748_vm1, %v1666_v0, 0.0 }
 0x947   : > { %1671 = vadd.xlane.f32.xlu1 %v1670_v1 }
 0x9ce   : > { %v1675_v2 = vpop.xlane.xlu0 %1674 }
 0x9cf   : > { %v1677_v35 = vmul.f32 0.03125, %v1675_v2 }
 0x9d0   : > { %v1672_v3 = vpop.xlane.xlu1 %1671 }
 0x9d1   : > { %v1679_v32 = vsub.f32 %v1667_v62, %v1677_v35  ;;  %v1676_v4 = vmul.f32 0.03125, %v1672_v3 }
 0x9d3   : > { %v1678_v5 = vsub.f32 %v1666_v0, %v1676_v4  ;;  %v1681_v6 = vmul.f32 %v1679_v32, %v1679_v32 }
 0x9d5   : > { %v1685_v7 = vsel %vm748_vm1, %v1681_v6, 0.0  ;;  %v1680_v8 = vmul.f32 %v1678_v5, %v1678_v5 }
 0x9d6   : > { %1686 = vadd.xlane.f32.xlu0 %v1685_v7 }
 0x9d7   : > { %v1682_v9 = vsel %vm748_vm1, %v1680_v8, 0.0 }
 0x9d8   : > { %1683 = vadd.xlane.f32.xlu1 %v1682_v9 }
 0xa5f   : > { %v1687_v10 = vpop.xlane.xlu0 %1686 }
 0xa60   : > { %v1689_v11 = vmul.f32 0.03125, %v1687_v10 }
 0xa61   : > { %v1684_v12 = vpop.xlane.xlu1 %1683 }
 0xa62   : > { %v1691_v13 = vadd.f32 1e-12, %v1689_v11  ;;  %v1688_v14 = vmul.f32 0.03125, %v1684_v12 }
 0xa64   : > { %2071 = vrsqrt.f32 %v1691_v13  ;;  %v1690_v15 = vadd.f32 1e-12, %v1688_v14 }
 0xa66   : > { %2073 = vrsqrt.f32 %v1690_v15 }
 0xa71   : > { %v2072_v16 = vpop.eup %2071 }
 0xa72   : > { %v1695_v18 = vmul.f32 %v2072_v16, %v1679_v32 }
 0xa73   : > { %v2074_v19 = vpop.eup %2073 }
 0xa74   : > { %v1703_v21 = vmul.f32 %v1893_v17, %v1695_v18  ;;  %v1694_v22 = vmul.f32 %v2074_v19, %v1678_v5 }
 0xa76   : > { %v1711_v23 = vadd.f32 %v1894_v20, %v1703_v21  ;;  %v1702_v24 = vmul.f32 %v1893_v17, %v1694_v22 }
 0xa78   : > { %1713 = vst.msk [vmem:[%s2450_s22 + $0x8] sm:$0xff] %vm748_vm1, %v1711_v23  ;;  %v1710_v25 = vadd.f32 %v1894_v20, %v1702_v24 }
 0xa7a   : > { %1712 = vst.msk [vmem:[%s2450_s22] sm:$0xff] %vm748_vm1, %v1710_v25 }
 0xa7b PF: > { %s2458_s19 = sld [smem:[#allocation2_spill]] }
 0xa81   : > { %s26_s21 = sadd.s32 1, %s2458_s19  }
 0xa82   : > { %p23_p5 = scmp.ge.s32.totalorder %s26_s21, 4  }
 0xa84   :  { %25 = sbr.rel (!%p23_p5) target bundleno = 7 (0x7), region = 147 }

</bundles_post_ra>
